<compile_context>
chip_gen: v7x
topology: tpu7x:2x2x1
jax: 0.10.0
libtpu: 0.0.40
codegen_flags: <defaults>
</compile_context>

<pallas_src>
import math

import jax
import jax.numpy as jnp
import numpy as np
from jax.experimental import pallas as pl
from jax.experimental.pallas import tpu as pltpu


# ---------------------------------------------------------------------------
# Kernel
# ---------------------------------------------------------------------------
def _attention_kernel(kxt_ref, kxp_ref, qx_ref, bp_ref, out_ref, score_ref):
    """score -> softmax(dim=0) -> context -> +proj bias, for one q tile.

    kxt_ref  : (B, Hp, Lkp)  bf16  w_k(k)^T                    (grid-invariant)
    kxp_ref  : (B, Lkp, Op)  bf16  w_k(k) @ W_proj             (grid-invariant)
    qx_ref   : (B, tq, Hp)   bf16  w_q(q), this q tile
    bp_ref   : (1, 1, Op)    f32   proj bias                   (grid-invariant)
    out_ref  : (B, tq, Op)   f32
    score_ref: (B, tq, Lkp)  f32 / bf16
    """
    # 'dot_product' score: bmm(qx, kx^T); kx^T is precomputed -> no in-kernel
    # transpose, RHS contracts on its sublane dim (natural MXU feed).
    score = jnp.einsum('bqh,bhk->bqk', qx_ref[...], kxt_ref[...],
                       preferred_element_type=jnp.float32)

    # F.softmax(score, dim=0): normalize over the BATCH dimension (reference
    # quirk).  Exact only because the whole batch is resident in this block.
    m = jnp.max(score, axis=0, keepdims=True)
    e = jnp.exp(score - m)
    denom = jnp.sum(e, axis=0, keepdims=True)
    # approx=False: the normalized attention map is returned to the caller.
    attn = e * pl.reciprocal(denom, approx=False)

    # output = proj(bmm(attn, kx)) = bmm(attn, kx @ W_proj) + b_proj
    # (exact algebraic rewrite for n_head=1, dropout=0; fold done in wrapper).
    out = jnp.einsum('bqk,bko->bqo', attn.astype(jnp.bfloat16), kxp_ref[...],
                     preferred_element_type=jnp.float32)
    out_ref[...] = (out + bp_ref[...]).astype(out_ref.dtype)
    score_ref[...] = attn.astype(score_ref.dtype)


# ---------------------------------------------------------------------------
# Helpers
# ---------------------------------------------------------------------------
def _round_up(x, m):
    return ((x + m - 1) // m) * m


def _device_kind():
    try:
        return jax.devices()[0].device_kind.lower()
    except Exception:  # pragma: no cover - device query is best-effort
        return ""


def _is_v7(kind):
    return "v7" in kind or "7x" in kind


def _is_v6(kind):
    return "v6" in kind


def _is_v5(kind):
    return "v5" in kind


def _pick_q_tile(q_len, kind):
    """q tile: multiple of 16 (bf16 packing) dividing q_len, generation-aware."""
    if _is_v7(kind):
        target = 128               # 64 MiB VMEM per TC -> smaller tiles
        force_split = q_len >= 32  # >=2 grid steps so both TCs get work
    elif _is_v6(kind) or _is_v5(kind):
        target = 512               # 128 MiB VMEM; big tiles amortize ~0.35us/step
        force_split = False
    else:
        target = 256
        force_split = False
    if force_split:
        target = min(target, max(16, q_len // 2))
    if q_len <= target and not force_split:
        return q_len
    upper = min(target, q_len)
    upper -= upper % 16
    for t in range(upper, 15, -16):
        if q_len % t == 0:
            return t
    return q_len  # no valid divisor; fall back to a single full-extent block


# ---------------------------------------------------------------------------
# Wrapper
# ---------------------------------------------------------------------------
def attention_forward(k, q, params, *, q_tile=None, score_dtype=None):
    """Pallas wrapper reproducing Attention.forward -> (output, score)."""
    # TODO(synk): n_head > 1 and the 'mlp' / 'bi_linear' / 'scaled_dot_product'
    # score functions are not implemented; this kernel covers the module's
    # default configuration (dropout=0 is the identity).
    if q.ndim == 2:
        q = q[:, None, :]
    if k.ndim == 2:
        k = k[:, None, :]
    wk, bk, wq, bq, wp, bp = params
    B, Lk, E = k.shape
    Bq, Lq, Eq = q.shape
    assert Bq == B and Eq == E
    H = wk.shape[1]
    out_dim = wp.shape[1]

    kind = _device_kind()
    if score_dtype is None:
        # v5e (~0.8 TB/s HBM): the B*Lq*Lk score writeback dominates -> bf16.
        score_dtype = jnp.bfloat16 if (_is_v5(kind) and not _is_v6(kind)) else jnp.float32
    score_bytes = jnp.dtype(score_dtype).itemsize

    # ---- hoisted projections (plain XLA, computed once, f32) -----------------
    kx = jnp.einsum('ble,eh->blh', k, wk) + bk            # w_k(k): (B, Lk, H)
    qx = jnp.einsum('ble,eh->blh', q, wq) + bq            # w_q(q): (B, Lq, H)
    kxp = jnp.einsum('blh,ho->blo', kx, wp)               # w_k(k) @ W_proj

    # ---- pad to MXU/lane-friendly sizes (zero padding is exact) --------------
    Hp = _round_up(H, 128)        # contraction dim of the score matmul
    Lkp = _round_up(Lk, 128)      # lane dim of the score / attn output
    Op = _round_up(out_dim, 128)  # lane dim of the main output
    kxt_p = jnp.pad(jnp.swapaxes(kx, 1, 2),
                    ((0, 0), (0, Hp - H), (0, Lkp - Lk))).astype(jnp.bfloat16)
    qx_p = jnp.pad(qx, ((0, 0), (0, 0), (0, Hp - H))).astype(jnp.bfloat16)
    kxp_p = jnp.pad(kxp, ((0, 0), (0, Lkp - Lk), (0, Op - out_dim))).astype(jnp.bfloat16)
    bp_p = jnp.pad(jnp.reshape(bp, (1, 1, out_dim)).astype(jnp.float32),
                   ((0, 0), (0, 0), (0, Op - out_dim)))

    # ---- q tiling (batch is NEVER tiled: dim=0 softmax needs all B resident) --
    tq = _pick_q_tile(Lq, kind) if q_tile is None else q_tile
    assert Lq % tq == 0, "q_tile must divide q_len"
    assert tq == Lq or tq % 16 == 0, "q_tile must be a multiple of 16 (bf16 packing)"
    grid = (Lq // tq,)
    # TODO(synk): at very large Lk on v7x (64 MiB VMEM/TC) the grid-invariant
    # kxt/kxp residency can overflow; add a second "arbitrary" grid axis over Lk
    # with an f32 accumulator (the dim=0 softmax is per-(q,k) over batch only,
    # so k-tiling is exact).  Not needed at the shapes exercised here.

    # ---- cost estimate & generation-aware VMEM budget -------------------------
    flops = (2 * B * Lq * Lkp * Hp          # score matmul
             + 2 * B * Lq * Lkp * Op        # context (W_proj folded) matmul
             + B * Lq * Op)                 # bias add
    bytes_accessed = (2 * B * Hp * Lkp + 2 * B * Lkp * Op + 2 * B * Lq * Hp
                      + 4 * Op + 4 * B * Lq * Op + score_bytes * B * Lq * Lkp)
    cost = pl.CostEstimate(flops=flops, transcendentals=B * Lq * Lkp,
                           bytes_accessed=bytes_accessed)

    invariant_bytes = 2 * B * Hp * Lkp + 2 * B * Lkp * Op + 4 * Op
    per_step = 2 * (2 * B * tq * Hp + 4 * B * tq * Op + score_bytes * B * tq * Lkp)
    temps = 6 * 4 * B * tq * Lkp            # f32 score / exp temporaries
    vmem_est = 2 * invariant_bytes + per_step + temps
    if _is_v7(kind):
        vmem_cap = 48 * 2 ** 20             # 64 MiB physical/TC: leave headroom
    elif _is_v6(kind) or _is_v5(kind):
        vmem_cap = 100 * 2 ** 20            # 128 MiB physical
    else:
        vmem_cap = 64 * 2 ** 20
    vmem_limit = int(min(vmem_cap, max(32 * 2 ** 20, 2 * vmem_est)))

    # ---- pallas_call ----------------------------------------------------------
    def build(single_buffer_invariants):
        def inv_spec(shape):
            n = len(shape)
            idx = lambda i, _n=n: (0,) * _n
            if single_buffer_invariants:
                # Grid-invariant block: single buffer, no per-step re-fetch.
                return pl.BlockSpec(shape, idx, pipeline_mode=pl.Buffered(1))
            return pl.BlockSpec(shape, idx)

        return pl.pallas_call(
            _attention_kernel,
            out_shape=(jax.ShapeDtypeStruct((B, Lq, Op), jnp.float32),
                       jax.ShapeDtypeStruct((B, Lq, Lkp), score_dtype)),
            grid=grid,
            in_specs=[
                inv_spec((B, Hp, Lkp)),                          # kx^T
                inv_spec((B, Lkp, Op)),                          # kx @ W_proj
                pl.BlockSpec((B, tq, Hp), lambda i: (0, i, 0)),  # qx tile
                inv_spec((1, 1, Op)),                            # proj bias
            ],
            out_specs=(
                pl.BlockSpec((B, tq, Op), lambda i: (0, i, 0)),
                pl.BlockSpec((B, tq, Lkp), lambda i: (0, i, 0)),
            ),
            compiler_params=pltpu.CompilerParams(
                dimension_semantics=("parallel",),
                vmem_limit_bytes=vmem_limit),
            cost_estimate=cost,
        )

    try:
        out_p, score_p = build(True)(kxt_p, kxp_p, qx_p, bp_p)
    except Exception:
        # Fallback for jax releases without BlockSpec.pipeline_mode / Buffered(1)
        # support; identical kernel, default (double) buffering of invariants.
        out_p, score_p = build(False)(kxt_p, kxp_p, qx_p, bp_p)

    # Slice off the zero padding (exact).
    return out_p[:, :, :out_dim], score_p[:, :, :Lk]


# ---------------------------------------------------------------------------
# Pure-JAX reference & init
# ---------------------------------------------------------------------------
def attention_ref(k, q, params):
    """Pure-JAX f32 reference (mirrors the PyTorch forward for n_head=1)."""
    wk, bk, wq, bq, wp, bp = params
    if q.ndim == 2:
        q = q[:, None, :]
    if k.ndim == 2:
        k = k[:, None, :]
    kx = k @ wk + bk
    qx = q @ wq + bq
    score = jnp.einsum('bqd,bkd->bqk', qx, kx)
    attn = jax.nn.softmax(score, axis=0)          # dim=0 softmax, as in the reference
    out = jnp.einsum('bqk,bkd->bqd', attn, kx)
    return out @ wp + bp, attn


def init_params(key, embed_dim, hidden_dim, out_dim):
    """Deterministic nn.Linear-style init: U(-1/sqrt(fan_in), 1/sqrt(fan_in))."""
    ks = jax.random.split(key, 6)

    def lin(kw, kb, fan_in, fan_out):
        bound = 1.0 / math.sqrt(fan_in)
        w = jax.random.uniform(kw, (fan_in, fan_out), jnp.float32, -bound, bound)
        b = jax.random.uniform(kb, (1, fan_out), jnp.float32, -bound, bound)
        return w, b

    wk, bk = lin(ks[0], ks[1], embed_dim, hidden_dim)
    wq, bq = lin(ks[2], ks[3], embed_dim, hidden_dim)
    wp, bp = lin(ks[4], ks[5], hidden_dim, out_dim)   # proj: in = n_head*hidden
    return (wk, bk, wq, bq, wp, bp)


if __name__ == "__main__":
    B, Lk, Lq, E = 2, 8, 8, 32
    n_head = 1
    H = E // n_head          # hidden_dim default
    out_dim = E              # out_dim default

    key = jax.random.PRNGKey(0)
    kp, kk, kq = jax.random.split(key, 3)
    params = init_params(kp, E, n_head * H, out_dim)
    k = jax.random.normal(kk, (B, Lk, E), jnp.float32)
    q = jax.random.normal(kq, (B, Lq, E), jnp.float32)

    out, score = attention_forward(k, q, params)
    out = jax.block_until_ready(out)
    score = jax.block_until_ready(score)

    out_ref, score_ref = attention_ref(k, q, params)
    # bf16 MXU operands (f32 accumulation) -> tolerances loosened vs. f32 ref.
    np.testing.assert_allclose(np.asarray(out, dtype=np.float32),
                               np.asarray(out_ref), rtol=5e-2, atol=2e-2)
    np.testing.assert_allclose(np.asarray(jnp.asarray(score, jnp.float32)),
                               np.asarray(score_ref), rtol=5e-2, atol=2e-2)

    print("KERNEL_OK")
</pallas_src>

<mosaic_0001>
module attributes {stable_mosaic.version = 11 : i64} {
  func.func @_attention_kernel(%arg0: i32, %arg1: memref<2x128x128xbf16, #tpu.memory_space<vmem>>, %arg2: memref<2x128x128xbf16, #tpu.memory_space<vmem>>, %arg3: memref<2x8x128xbf16, #tpu.memory_space<vmem>>, %arg4: memref<1x1x128xf32, #tpu.memory_space<vmem>>, %arg5: memref<2x8x128xf32, #tpu.memory_space<vmem>>, %arg6: memref<2x8x128xf32, #tpu.memory_space<vmem>>) attributes {dimension_semantics = [#tpu.dimension_semantics<parallel>], iteration_bounds = array<i64: 1>, scalar_prefetch = 0 : i64, scratch_operands = 0 : i64, tpu.core_type = #tpu.core_type<tc>, window_params = [{pipeline_mode = #tpu.pipeline_mode<synchronous>, transform_indices = @transform_0, window_bounds = array<i64: 2, 128, 128>}, {pipeline_mode = #tpu.pipeline_mode<synchronous>, transform_indices = @transform_1, window_bounds = array<i64: 2, 128, 128>}, {transform_indices = @transform_2, window_bounds = array<i64: 2, 8, 128>}, {pipeline_mode = #tpu.pipeline_mode<synchronous>, transform_indices = @transform_3, window_bounds = array<i64: 1, 1, 128>}, {transform_indices = @transform_4, window_bounds = array<i64: 2, 8, 128>}, {transform_indices = @transform_5, window_bounds = array<i64: 2, 8, 128>}]} {
    %c0 = arith.constant 0 : index
    %c0_0 = arith.constant 0 : index
    %c0_1 = arith.constant 0 : index
    %0 = vector.load %arg3[%c0, %c0_0, %c0_1] : memref<2x8x128xbf16, #tpu.memory_space<vmem>>, vector<2x8x128xbf16>
    %c0_2 = arith.constant 0 : index
    %c0_3 = arith.constant 0 : index
    %c0_4 = arith.constant 0 : index
    %1 = vector.load %arg1[%c0_2, %c0_3, %c0_4] : memref<2x128x128xbf16, #tpu.memory_space<vmem>>, vector<2x128x128xbf16>
    "tpu.trace_start"() <{level = 10 : i32, message = "bqh,bhk->bqk"}> : () -> ()
    %cst = arith.constant dense<0.000000e+00> : vector<2x8x128xf32>
    %2 = tpu.matmul %0, %1, %cst {dimension_numbers = #tpu.dot_dimension_numbers<[2], [1], [1], [2], [0, 0, 0, 1, 1, 2], [0], [0]>} : vector<2x8x128xbf16>, vector<2x128x128xbf16>, vector<2x8x128xf32> -> vector<2x8x128xf32>
    "tpu.trace_stop"() : () -> ()
    %cst_5 = arith.constant dense<0xFF800000> : vector<8x128xf32>
    %3 = vector.multi_reduction <maximumf>, %2, %cst_5 [0] : vector<2x8x128xf32> to vector<8x128xf32>
    %4 = vector.shape_cast %3 : vector<8x128xf32> to vector<1x8x128xf32>
    %5 = vector.broadcast %4 : vector<1x8x128xf32> to vector<2x8x128xf32>
    %6 = arith.subf %2, %5 : vector<2x8x128xf32>
    %7 = math.exp %6 : vector<2x8x128xf32>
    %cst_6 = arith.constant dense<0.000000e+00> : vector<8x128xf32>
    %8 = vector.multi_reduction <add>, %7, %cst_6 [0] : vector<2x8x128xf32> to vector<8x128xf32>
    %9 = vector.shape_cast %8 : vector<8x128xf32> to vector<1x8x128xf32>
    %10 = tpu.reciprocal %9 : vector<1x8x128xf32> -> vector<1x8x128xf32>
    %11 = vector.broadcast %10 : vector<1x8x128xf32> to vector<2x8x128xf32>
    %12 = arith.mulf %7, %11 : vector<2x8x128xf32>
    %13 = arith.truncf %12 : vector<2x8x128xf32> to vector<2x8x128xbf16>
    %c0_7 = arith.constant 0 : index
    %c0_8 = arith.constant 0 : index
    %c0_9 = arith.constant 0 : index
    %14 = vector.load %arg2[%c0_7, %c0_8, %c0_9] : memref<2x128x128xbf16, #tpu.memory_space<vmem>>, vector<2x128x128xbf16>
    "tpu.trace_start"() <{level = 10 : i32, message = "bqk,bko->bqo"}> : () -> ()
    %cst_10 = arith.constant dense<0.000000e+00> : vector<2x8x128xf32>
    %15 = tpu.matmul %13, %14, %cst_10 {dimension_numbers = #tpu.dot_dimension_numbers<[2], [1], [1], [2], [0, 0, 0, 1, 1, 2], [0], [0]>} : vector<2x8x128xbf16>, vector<2x128x128xbf16>, vector<2x8x128xf32> -> vector<2x8x128xf32>
    "tpu.trace_stop"() : () -> ()
    %c0_11 = arith.constant 0 : index
    %c0_12 = arith.constant 0 : index
    %c0_13 = arith.constant 0 : index
    %16 = vector.load %arg4[%c0_11, %c0_12, %c0_13] : memref<1x1x128xf32, #tpu.memory_space<vmem>>, vector<1x1x128xf32>
    %17 = vector.broadcast %16 : vector<1x1x128xf32> to vector<2x8x128xf32>
    %18 = arith.addf %15, %17 : vector<2x8x128xf32>
    %c0_14 = arith.constant 0 : index
    %c0_15 = arith.constant 0 : index
    %c0_16 = arith.constant 0 : index
    %19 = vector.load %arg5[%c0_14, %c0_15, %c0_16] : memref<2x8x128xf32, #tpu.memory_space<vmem>>, vector<2x8x128xf32>
    tpu.vector_store %arg5[%c0_14, %c0_15, %c0_16], %18 {strides = array<i32>} : memref<2x8x128xf32, #tpu.memory_space<vmem>>, vector<2x8x128xf32>,
    %c0_17 = arith.constant 0 : index
    %c0_18 = arith.constant 0 : index
    %c0_19 = arith.constant 0 : index
    %20 = vector.load %arg6[%c0_17, %c0_18, %c0_19] : memref<2x8x128xf32, #tpu.memory_space<vmem>>, vector<2x8x128xf32>
    tpu.vector_store %arg6[%c0_17, %c0_18, %c0_19], %12 {strides = array<i32>} : memref<2x8x128xf32, #tpu.memory_space<vmem>>, vector<2x8x128xf32>,
    return
  }
  func.func @transform_0(%arg0: i32) -> (i32, i32, i32) {
    %c0_i32 = arith.constant 0 : i32
    %c0_i32_0 = arith.constant 0 : i32
    %c0_i32_1 = arith.constant 0 : i32
    %c0_i32_2 = arith.constant 0 : i32
    return %c0_i32, %c0_i32_0, %c0_i32_1 : i32, i32, i32
  }
  func.func @transform_1(%arg0: i32) -> (i32, i32, i32) {
    %c0_i32 = arith.constant 0 : i32
    %c0_i32_0 = arith.constant 0 : i32
    %c0_i32_1 = arith.constant 0 : i32
    %c0_i32_2 = arith.constant 0 : i32
    return %c0_i32, %c0_i32_0, %c0_i32_1 : i32, i32, i32
  }
  func.func @transform_2(%arg0: i32) -> (i32, i32, i32) {
    %c0_i32 = arith.constant 0 : i32
    %c0_i32_0 = arith.constant 0 : i32
    %c0_i32_1 = arith.constant 0 : i32
    return %c0_i32, %arg0, %c0_i32_0 : i32, i32, i32
  }
  func.func @transform_3(%arg0: i32) -> (i32, i32, i32) {
    %c0_i32 = arith.constant 0 : i32
    %c0_i32_0 = arith.constant 0 : i32
    %c0_i32_1 = arith.constant 0 : i32
    %c0_i32_2 = arith.constant 0 : i32
    return %c0_i32, %c0_i32_0, %c0_i32_1 : i32, i32, i32
  }
  func.func @transform_4(%arg0: i32) -> (i32, i32, i32) {
    %c0_i32 = arith.constant 0 : i32
    %c0_i32_0 = arith.constant 0 : i32
    %c0_i32_1 = arith.constant 0 : i32
    return %c0_i32, %arg0, %c0_i32_0 : i32, i32, i32
  }
  func.func @transform_5(%arg0: i32) -> (i32, i32, i32) {
    %c0_i32 = arith.constant 0 : i32
    %c0_i32_0 = arith.constant 0 : i32
    %c0_i32_1 = arith.constant 0 : i32
    return %c0_i32, %arg0, %c0_i32_0 : i32, i32, i32
  }
}

module attributes {stable_mosaic.version = 11 : i64} {
  func.func @_attention_kernel(%arg0: i32, %arg1: memref<2x128x128xbf16, #tpu.memory_space<vmem>>, %arg2: memref<2x128x128xbf16, #tpu.memory_space<vmem>>, %arg3: memref<2x8x128xbf16, #tpu.memory_space<vmem>>, %arg4: memref<1x1x128xf32, #tpu.memory_space<vmem>>, %arg5: memref<2x8x128xf32, #tpu.memory_space<vmem>>, %arg6: memref<2x8x128xf32, #tpu.memory_space<vmem>>) attributes {dimension_semantics = [#tpu.dimension_semantics<parallel>], iteration_bounds = array<i64: 1>, scalar_prefetch = 0 : i64, scratch_operands = 0 : i64, tpu.core_type = #tpu.core_type<tc>, window_params = [{pipeline_mode = #tpu.pipeline_mode<synchronous>, transform_indices = @transform_0, window_bounds = array<i64: 2, 128, 128>}, {pipeline_mode = #tpu.pipeline_mode<synchronous>, transform_indices = @transform_1, window_bounds = array<i64: 2, 128, 128>}, {transform_indices = @transform_2, window_bounds = array<i64: 2, 8, 128>}, {pipeline_mode = #tpu.pipeline_mode<synchronous>, transform_indices = @transform_3, window_bounds = array<i64: 1, 1, 128>}, {transform_indices = @transform_4, window_bounds = array<i64: 2, 8, 128>}, {transform_indices = @transform_5, window_bounds = array<i64: 2, 8, 128>}]} {
    %c0 = arith.constant 0 : index
    %c0_0 = arith.constant 0 : index
    %c0_1 = arith.constant 0 : index
    %0 = vector.load %arg3[%c0, %c0_0, %c0_1] : memref<2x8x128xbf16, #tpu.memory_space<vmem>>, vector<2x8x128xbf16>
    %c0_2 = arith.constant 0 : index
    %c0_3 = arith.constant 0 : index
    %c0_4 = arith.constant 0 : index
    %1 = vector.load %arg1[%c0_2, %c0_3, %c0_4] : memref<2x128x128xbf16, #tpu.memory_space<vmem>>, vector<2x128x128xbf16>
    "tpu.trace_start"() <{level = 10 : i32, message = "bqh,bhk->bqk"}> : () -> ()
    %cst = arith.constant dense<0.000000e+00> : vector<2x8x128xf32>
    %2 = tpu.matmul %0, %1, %cst {dimension_numbers = #tpu.dot_dimension_numbers<[2], [1], [1], [2], [0, 0, 0, 1, 1, 2], [0], [0]>} : vector<2x8x128xbf16>, vector<2x128x128xbf16>, vector<2x8x128xf32> -> vector<2x8x128xf32>
    "tpu.trace_stop"() : () -> ()
    %cst_5 = arith.constant dense<0xFF800000> : vector<8x128xf32>
    %3 = vector.multi_reduction <maximumf>, %2, %cst_5 [0] : vector<2x8x128xf32> to vector<8x128xf32>
    %4 = vector.shape_cast %3 : vector<8x128xf32> to vector<1x8x128xf32>
    %5 = vector.broadcast %4 : vector<1x8x128xf32> to vector<2x8x128xf32>
    %6 = arith.subf %2, %5 : vector<2x8x128xf32>
    %7 = math.exp %6 : vector<2x8x128xf32>
    %cst_6 = arith.constant dense<0.000000e+00> : vector<8x128xf32>
    %8 = vector.multi_reduction <add>, %7, %cst_6 [0] : vector<2x8x128xf32> to vector<8x128xf32>
    %9 = vector.shape_cast %8 : vector<8x128xf32> to vector<1x8x128xf32>
    %10 = tpu.reciprocal %9 : vector<1x8x128xf32> -> vector<1x8x128xf32>
    %11 = vector.broadcast %10 : vector<1x8x128xf32> to vector<2x8x128xf32>
    %12 = arith.mulf %7, %11 : vector<2x8x128xf32>
    %13 = arith.truncf %12 : vector<2x8x128xf32> to vector<2x8x128xbf16>
    %c0_7 = arith.constant 0 : index
    %c0_8 = arith.constant 0 : index
    %c0_9 = arith.constant 0 : index
    %14 = vector.load %arg2[%c0_7, %c0_8, %c0_9] : memref<2x128x128xbf16, #tpu.memory_space<vmem>>, vector<2x128x128xbf16>
    "tpu.trace_start"() <{level = 10 : i32, message = "bqk,bko->bqo"}> : () -> ()
    %cst_10 = arith.constant dense<0.000000e+00> : vector<2x8x128xf32>
    %15 = tpu.matmul %13, %14, %cst_10 {dimension_numbers = #tpu.dot_dimension_numbers<[2], [1], [1], [2], [0, 0, 0, 1, 1, 2], [0], [0]>} : vector<2x8x128xbf16>, vector<2x128x128xbf16>, vector<2x8x128xf32> -> vector<2x8x128xf32>
    "tpu.trace_stop"() : () -> ()
    %c0_11 = arith.constant 0 : index
    %c0_12 = arith.constant 0 : index
    %c0_13 = arith.constant 0 : index
    %16 = vector.load %arg4[%c0_11, %c0_12, %c0_13] : memref<1x1x128xf32, #tpu.memory_space<vmem>>, vector<1x1x128xf32>
    %17 = vector.broadcast %16 : vector<1x1x128xf32> to vector<2x8x128xf32>
    %18 = arith.addf %15, %17 : vector<2x8x128xf32>
    %c0_14 = arith.constant 0 : index
    %c0_15 = arith.constant 0 : index
    %c0_16 = arith.constant 0 : index
    %19 = vector.load %arg5[%c0_14, %c0_15, %c0_16] : memref<2x8x128xf32, #tpu.memory_space<vmem>>, vector<2x8x128xf32>
    tpu.vector_store %arg5[%c0_14, %c0_15, %c0_16], %18 {strides = array<i32>} : memref<2x8x128xf32, #tpu.memory_space<vmem>>, vector<2x8x128xf32>,
    %c0_17 = arith.constant 0 : index
    %c0_18 = arith.constant 0 : index
    %c0_19 = arith.constant 0 : index
    %20 = vector.load %arg6[%c0_17, %c0_18, %c0_19] : memref<2x8x128xf32, #tpu.memory_space<vmem>>, vector<2x8x128xf32>
    tpu.vector_store %arg6[%c0_17, %c0_18, %c0_19], %12 {strides = array<i32>} : memref<2x8x128xf32, #tpu.memory_space<vmem>>, vector<2x8x128xf32>,
    return
  }
  func.func @transform_0(%arg0: i32) -> (i32, i32, i32) {
    %c0_i32 = arith.constant 0 : i32
    %c0_i32_0 = arith.constant 0 : i32
    %c0_i32_1 = arith.constant 0 : i32
    %c0_i32_2 = arith.constant 0 : i32
    return %c0_i32, %c0_i32_0, %c0_i32_1 : i32, i32, i32
  }
  func.func @transform_1(%arg0: i32) -> (i32, i32, i32) {
    %c0_i32 = arith.constant 0 : i32
    %c0_i32_0 = arith.constant 0 : i32
    %c0_i32_1 = arith.constant 0 : i32
    %c0_i32_2 = arith.constant 0 : i32
    return %c0_i32, %c0_i32_0, %c0_i32_1 : i32, i32, i32
  }
  func.func @transform_2(%arg0: i32) -> (i32, i32, i32) {
    %c0_i32 = arith.constant 0 : i32
    %c0_i32_0 = arith.constant 0 : i32
    %c0_i32_1 = arith.constant 0 : i32
    return %c0_i32, %arg0, %c0_i32_0 : i32, i32, i32
  }
  func.func @transform_3(%arg0: i32) -> (i32, i32, i32) {
    %c0_i32 = arith.constant 0 : i32
    %c0_i32_0 = arith.constant 0 : i32
    %c0_i32_1 = arith.constant 0 : i32
    %c0_i32_2 = arith.constant 0 : i32
    return %c0_i32, %c0_i32_0, %c0_i32_1 : i32, i32, i32
  }
  func.func @transform_4(%arg0: i32) -> (i32, i32, i32) {
    %c0_i32 = arith.constant 0 : i32
    %c0_i32_0 = arith.constant 0 : i32
    %c0_i32_1 = arith.constant 0 : i32
    return %c0_i32, %arg0, %c0_i32_0 : i32, i32, i32
  }
  func.func @transform_5(%arg0: i32) -> (i32, i32, i32) {
    %c0_i32 = arith.constant 0 : i32
    %c0_i32_0 = arith.constant 0 : i32
    %c0_i32_1 = arith.constant 0 : i32
    return %c0_i32, %arg0, %c0_i32_0 : i32, i32, i32
  }
}

</mosaic_0001>

<bundles_post_ra>
// kernel: tpu_custom_call.1
= control target key start
LH: loop header
LB: loop body
LE: loop exit
PB: predicated region body
PF: predicated region fallthrough
CT: control target
= control target key end

     0   :  { %11 = vsyncpa [#allocation3], 0  ;;  %s1021_s0 = inlined_call_operand.hbm [shape: bf16[2,128,128], index: 0, kind: input, shape index: {}]   ;;  %s1022_s1 = inlined_call_operand.hbm [shape: bf16[2,128,128], index: 1, kind: input, shape index: {}]   ;;  %s1023_s2 = inlined_call_operand.hbm [shape: bf16[2,8,128], index: 2, kind: input, shape index: {}]   ;;  %s1024_s3 = inlined_call_operand.vmem [shape: f32[1,1,128], index: 3, kind: input, shape index: {}]   ;;  %s1025_s4 = inlined_call_operand.hbm [shape: f32[2,8,128], index: 4, kind: output, shape index: {0}]   ;;  %s1026_s5 = inlined_call_operand.hbm [shape: f32[2,8,128], index: 5, kind: output, shape index: {1}]  }
   0x1   :  { %12 = vsyncpa [#allocation6], 0 }
   0x2   :  { %13 = vsyncpa [#allocation4], 0 }
   0x3   :  { %14 = vsyncpa [#allocation10], 0  ;;  %s855_s18 = smov [#allocation5]   ;;  %s856_s20 = smov [#allocation2]  }
   0x4   :  { %s32_s19 = sshll.u32 %s855_s18, 4  ;;  %s20_s21 = sshll.u32 %s856_s20, 4  ;;  %s33_s19 = int_to_ptr.vmem [resolvable:$true] %s32_s19  ;;  %s896_s21 = int_to_ptr.vmem [resolvable:$true] %s20_s21 }
   0x5   :  { %s737_s24 = scalar_lea.hbm %s1022_s1, 2048 }
   0x6   :  { %p738_p0 = scmp.ne.s32.totalorder %s1022_s1, %s737_s24  ;;  %p741_p1 = scmp.lt.u32.totalorder %s737_s24, %s1022_s1 }
   0x8   :  { %p743_p2 = pnand %p741_p1, %p738_p0 }
   0xa   :  { %746 = shalt.err (!%p743_p2)
}
   0xb   :  { %s747_s29 = scalar_lea.vmem %s33_s19, 2048  ;;  %p752_p4 = scmp.lt.s32.totalorder %s33_s19, %s33_s19 }
   0xc   :  { %p748_p3 = scmp.ne.s32.totalorder %s33_s19, %s747_s29  ;;  %p753_p5 = scmp.lt.s32.totalorder %s747_s29, %s747_s29 }
   0xe   :  { %p754_p6 = por %p753_p5, %p752_p4 }
  0x10   :  { %p755_p7 = pnand %p754_p6, %p748_p3 }
  0x12   :  { %758 = shalt.err (!%p755_p7)
}
  0x13   :  { %s857_s30 = smov 64   ;;  %s858_s6 = smov 4  }
  0x14   :  { %38 = dma.hbm_to_vmem [thread:$0]  %s1022_s1, 2048, %s33_s19, [#allocation6], %s857_s30, %s857_s30, %s858_s6  }
  0x15   :  { %s759_s11 = scalar_lea.hbm %s1021_s0, 2048 }
  0x16   :  { %p760_p8 = scmp.ne.s32.totalorder %s1021_s0, %s759_s11  ;;  %p763_p9 = scmp.lt.u32.totalorder %s759_s11, %s1021_s0 }
  0x18   :  { %p765_p10 = pnand %p763_p9, %p760_p8 }
  0x1a   :  { %768 = shalt.err (!%p765_p10)
}
  0x1b   :  { %s769_s16 = scalar_lea.vmem %s896_s21, 2048  ;;  %p774_p12 = scmp.lt.s32.totalorder %s896_s21, %s896_s21 }
  0x1c   :  { %p770_p11 = scmp.ne.s32.totalorder %s896_s21, %s769_s16  ;;  %p775_p13 = scmp.lt.s32.totalorder %s769_s16, %s769_s16 }
  0x1e   :  { %p776_p0 = por %p775_p13, %p774_p12 }
  0x20   :  { %p777_p1 = pnand %p776_p0, %p770_p11 }
  0x22   :  { %780 = shalt.err (!%p777_p1)
}
  0x23   :  { %26 = dma.hbm_to_vmem [thread:$0]  %s1021_s0, 2048, %s896_s21, [#allocation3], %s857_s30, %s857_s30, %s858_s6  }
  0x24   :  { %s859_s18 = smov [#allocation7]   ;;  %s781_s23 = scalar_lea.hbm %s1023_s2, 128 }
  0x25   :  { %s44_s19 = sshll.u32 %s859_s18, 4  ;;  %p782_p2 = scmp.ne.s32.totalorder %s1023_s2, %s781_s23  ;;  %s45_s19 = int_to_ptr.vmem [resolvable:$true] %s44_s19 }
  0x26   :  { %p785_p3 = scmp.lt.u32.totalorder %s781_s23, %s1023_s2 }
  0x28   :  { %p787_p4 = pnand %p785_p3, %p782_p2 }
  0x2a   :  { %790 = shalt.err (!%p787_p4)
}
  0x2b   :  { %s791_s28 = scalar_lea.vmem %s45_s19, 128  ;;  %p796_p6 = scmp.lt.s32.totalorder %s45_s19, %s45_s19 }
  0x2c   :  { %p792_p5 = scmp.ne.s32.totalorder %s45_s19, %s791_s28  ;;  %p797_p7 = scmp.lt.s32.totalorder %s791_s28, %s791_s28 }
  0x2e   :  { %p798_p8 = por %p797_p7, %p796_p6 }
  0x30   :  { %p799_p9 = pnand %p798_p8, %p792_p5 }
  0x32   :  { %802 = shalt.err (!%p799_p9)
}
  0x33   :  { %50 = dma.hbm_to_vmem [thread:$0]  %s1023_s2, 128, %s45_s19, [#allocation6], %s857_s30, %s857_s30, %s858_s6  }
  0x34   :  { %847 = dma.done.wait [#allocation3], 2048  }
  0x35   :  { %848 = vsyncadd [#allocation3], 4294965248 }
  0x36   :  { %849 = dma.done.wait [#allocation6], 2176  }
  0x37   :  { %850 = vsyncadd [#allocation6], 4294965120  ;;  %v860_v0 = vmov 0.0   ;;  %vm861_vm0 = vmmov 0   ;;  %v699_v1 = vld [vmem:[#allocation2] sm:$0xff]   ;;  %v701_v3 = vld [vmem:[#allocation2 + $0x8] sm:$0xff]  }
  0x38   :  { %608 = vmatprep.subr.bf16.mxu0 %v860_v0  ;;  %628 = vmatprep.subr.bf16.mxu1 %v860_v0  ;;  %v700_v2 = vld [vmem:[#allocation2 + $0x40] sm:$0xff]   ;;  %v702_v4 = vld [vmem:[#allocation2 + $0x48] sm:$0xff]   ;;  %v703_v5 = vld [vmem:[#allocation2 + $0x10] sm:$0xff]   ;;  %s862_s2 = smov [#allocation9]  }
  0x39   :  { %624 = vmatprep.mubr.msk.bf16.mxu0 %vm861_vm0, %v860_v0  ;;  %644 = vmatprep.mubr.msk.bf16.mxu1 %vm861_vm0, %v860_v0  ;;  %v704_v6 = vld [vmem:[#allocation2 + $0x50] sm:$0xff]   ;;  %v705_v7 = vld [vmem:[#allocation2 + $0x18] sm:$0xff]   ;;  %v707_v9 = vld [vmem:[#allocation2 + $0x20] sm:$0xff]   ;;  %s522_s29 = sshll.u32 %s862_s2, 4  ;;  %s523_s29 = int_to_ptr.vmem [resolvable:$true] %s522_s29 }
  0x3a   :  { %609 = vmatpush3.bf16.msra.mxu0 %v699_v1  ;;  %629 = vmatpush3.bf16.msra.mxu1 %v700_v2  ;;  %v706_v8 = vld [vmem:[#allocation2 + $0x58] sm:$0xff]   ;;  %v708_v10 = vld [vmem:[#allocation2 + $0x60] sm:$0xff]   ;;  %v709_v11 = vld [vmem:[#allocation2 + $0x28] sm:$0xff]   ;;  %s803_s30 = scalar_lea.vmem %s523_s29, 256  ;;  %p808_p11 = scmp.lt.s32.totalorder %s523_s29, %s523_s29 }
  0x3b   :  { %610 = vmatprep.subr.bf16.mxu0 %v860_v0  ;;  %630 = vmatprep.subr.bf16.mxu1 %v860_v0  ;;  %v710_v12 = vld [vmem:[#allocation2 + $0x68] sm:$0xff]   ;;  %v711_v13 = vld [vmem:[#allocation2 + $0x30] sm:$0xff]   ;;  %v713_v15 = vld [vmem:[#allocation2 + $0x38] sm:$0xff]   ;;  %p804_p10 = scmp.ne.s32.totalorder %s523_s29, %s803_s30  ;;  %p809_p12 = scmp.lt.s32.totalorder %s803_s30, %s803_s30 }
  0x3c   :  { %v712_v14 = vld [vmem:[#allocation2 + $0x70] sm:$0xff]   ;;  %v714_v16 = vld [vmem:[#allocation2 + $0x78] sm:$0xff]   ;;  %v63_v17 = vld [vmem:[#allocation7] sm:$0xf] }
  0x3d   :  { %v64_v18 = vld [vmem:[#allocation7 + $0x4] sm:$0xf]  ;;  %v717_v21 = vld [vmem:[#allocation5 + $0x8] sm:$0xff]   ;;  %v719_v23 = vld [vmem:[#allocation5 + $0x10] sm:$0xff]   ;;  %p810_p13 = por %p809_p12, %p808_p11 }
  0x3e   :  { %611 = vmatpush3.bf16.msra.mxu0 %v701_v3  ;;  %631 = vmatpush3.bf16.msra.mxu1 %v702_v4  ;;  %v715_v19 = vld [vmem:[#allocation5] sm:$0xff]   ;;  %v718_v22 = vld [vmem:[#allocation5 + $0x48] sm:$0xff]   ;;  %v720_v24 = vld [vmem:[#allocation5 + $0x50] sm:$0xff]  }
  0x3f   :  { %612 = vmatprep.subr.bf16.mxu0 %v860_v0  ;;  %632 = vmatprep.subr.bf16.mxu1 %v860_v0  ;;  %v716_v20 = vld [vmem:[#allocation5 + $0x40] sm:$0xff]   ;;  %v721_v25 = vld [vmem:[#allocation5 + $0x18] sm:$0xff]   ;;  %v725_v29 = vld [vmem:[#allocation5 + $0x28] sm:$0xff]   ;;  %p811_p0 = pnand %p810_p13, %p804_p10 }
  0x40   :  { %v722_v26 = vld [vmem:[#allocation5 + $0x58] sm:$0xff]   ;;  %v723_v27 = vld [vmem:[#allocation5 + $0x20] sm:$0xff]   ;;  %v726_v30 = vld [vmem:[#allocation5 + $0x68] sm:$0xff]  }
  0x41   :  { %v724_v28 = vld [vmem:[#allocation5 + $0x60] sm:$0xff]   ;;  %v727_v31 = vld [vmem:[#allocation5 + $0x30] sm:$0xff]   ;;  %v729_v33 = vld [vmem:[#allocation5 + $0x38] sm:$0xff]  }
  0x42   :  { %613 = vmatpush3.bf16.msra.mxu0 %v703_v5  ;;  %633 = vmatpush3.bf16.msra.mxu1 %v704_v6  ;;  %v728_v32 = vld [vmem:[#allocation5 + $0x70] sm:$0xff]   ;;  %v730_v34 = vld [vmem:[#allocation5 + $0x78] sm:$0xff]  }
  0x43   :  { %614 = vmatprep.subr.bf16.mxu0 %v860_v0  ;;  %634 = vmatprep.subr.bf16.mxu1 %v860_v0 }
  0x46   :  { %615 = vmatpush3.bf16.msra.mxu0 %v705_v7  ;;  %635 = vmatpush3.bf16.msra.mxu1 %v706_v8 }
  0x47   :  { %616 = vmatprep.subr.bf16.mxu0 %v860_v0  ;;  %636 = vmatprep.subr.bf16.mxu1 %v860_v0 }
  0x4a   :  { %617 = vmatpush3.bf16.msra.mxu0 %v707_v9  ;;  %637 = vmatpush3.bf16.msra.mxu1 %v708_v10 }
  0x4b   :  { %618 = vmatprep.subr.bf16.mxu0 %v860_v0  ;;  %638 = vmatprep.subr.bf16.mxu1 %v860_v0 }
  0x4e   :  { %619 = vmatpush3.bf16.msra.mxu0 %v709_v11  ;;  %639 = vmatpush3.bf16.msra.mxu1 %v710_v12 }
  0x4f   :  { %620 = vmatprep.subr.bf16.mxu0 %v860_v0  ;;  %640 = vmatprep.subr.bf16.mxu1 %v860_v0 }
  0x52   :  { %621 = vmatpush3.bf16.msra.mxu0 %v711_v13  ;;  %641 = vmatpush3.bf16.msra.mxu1 %v712_v14 }
  0x53   :  { %622 = vmatprep.subr.bf16.mxu0 %v860_v0  ;;  %642 = vmatprep.subr.bf16.mxu1 %v860_v0 }
  0x56   :  { %623 = vmatpush3.bf16.msra.mxu0 %v713_v15  ;;  %643 = vmatpush3.bf16.msra.mxu1 %v714_v16 }
  0x57   :  { %648 = vmatprep.subr.bf16.mxu0 %v860_v0  ;;  %668 = vmatprep.subr.bf16.mxu1 %v860_v0 }
  0x59   :  { %625 = vmatmul.mubr.bf16.vlgmr.msra.gmra.mrb[0].mxu0 %v63_v17  ;;  %645 = vmatmul.mubr.bf16.vlgmr.msra.gmra.mrb[0].mxu1 %v64_v18 }
  0x5a   :  { %664 = vmatprep.mubr.msk.bf16.mxu0 %vm861_vm0, %v860_v0  ;;  %684 = vmatprep.mubr.msk.bf16.mxu1 %vm861_vm0, %v860_v0 }
  0x5b   :  { %649 = vmatpush3.bf16.msra.mxu0 %v715_v19  ;;  %669 = vmatpush3.bf16.msra.mxu1 %v716_v20 }
  0x5c   :  { %650 = vmatprep.subr.bf16.mxu0 %v860_v0  ;;  %670 = vmatprep.subr.bf16.mxu1 %v860_v0 }
  0x5f   :  { %651 = vmatpush3.bf16.msra.mxu0 %v717_v21  ;;  %671 = vmatpush3.bf16.msra.mxu1 %v718_v22 }
  0x60   :  { %652 = vmatprep.subr.bf16.mxu0 %v860_v0  ;;  %672 = vmatprep.subr.bf16.mxu1 %v860_v0 }
  0x63   :  { %653 = vmatpush3.bf16.msra.mxu0 %v719_v23  ;;  %673 = vmatpush3.bf16.msra.mxu1 %v720_v24 }
  0x64   :  { %654 = vmatprep.subr.bf16.mxu0 %v860_v0  ;;  %674 = vmatprep.subr.bf16.mxu1 %v860_v0 }
  0x67   :  { %655 = vmatpush3.bf16.msra.mxu0 %v721_v25  ;;  %675 = vmatpush3.bf16.msra.mxu1 %v722_v26 }
  0x68   :  { %656 = vmatprep.subr.bf16.mxu0 %v860_v0  ;;  %676 = vmatprep.subr.bf16.mxu1 %v860_v0 }
  0x6b   :  { %657 = vmatpush3.bf16.msra.mxu0 %v723_v27  ;;  %677 = vmatpush3.bf16.msra.mxu1 %v724_v28 }
  0x6c   :  { %658 = vmatprep.subr.bf16.mxu0 %v860_v0  ;;  %678 = vmatprep.subr.bf16.mxu1 %v860_v0 }
  0x6f   :  { %659 = vmatpush3.bf16.msra.mxu0 %v725_v29  ;;  %679 = vmatpush3.bf16.msra.mxu1 %v726_v30 }
  0x70   :  { %660 = vmatprep.subr.bf16.mxu0 %v860_v0  ;;  %680 = vmatprep.subr.bf16.mxu1 %v860_v0 }
  0x73   :  { %661 = vmatpush3.bf16.msra.mxu0 %v727_v31  ;;  %681 = vmatpush3.bf16.msra.mxu1 %v728_v32 }
  0x74   :  { %662 = vmatprep.subr.bf16.mxu0 %v860_v0  ;;  %682 = vmatprep.subr.bf16.mxu1 %v860_v0 }
  0x77   :  { %663 = vmatpush3.bf16.msra.mxu0 %v729_v33  ;;  %683 = vmatpush3.bf16.msra.mxu1 %v730_v34 }
 0x12c   :  { %v179_v35 = vpop.f32.mrb[0].mxu0  ;;  %v267_v36 = vpop.f32.mrb[0].mxu1 }
 0x12d   :  { %v626_v37 = vpop.f32.mrb[1].mxu0  ;;  %v273_v38 = vmax.f32 %v179_v35, %v267_v36  ;;  %v646_v39 = vpop.f32.mrb[1].mxu1 }
 0x12e   :  { %v182_v40 = vpop.f32.mrb[2].mxu0  ;;  %v270_v41 = vpop.f32.mrb[2].mxu1 }
 0x12f   :  { %v627_v42 = vpop.f32.mrb[3].mxu0  ;;  %v274_v43 = vsub.f32 %v179_v35, %v273_v38  ;;  %v275_v44 = vsub.f32 %v267_v36, %v273_v38  ;;  %v647_v45 = vpop.f32.mrb[3].mxu1 }
 0x131   :  { %v276_v46 = vmul.f32 1.442695, %v274_v43  ;;  %v278_v47 = vmul.f32 1.442695, %v275_v44 }
 0x133   :  { %731 = vpow2.f32 %v276_v46 }
 0x134   :  { %733 = vpow2.f32 %v278_v47 }
 0x13d   :  { %v732_v48 = vpop.eup %731 }
 0x13e   :  { %v734_v49 = vpop.eup %733 }
 0x13f   :  { %v280_v50 = vadd.f32 %v734_v49, %v732_v48 }
 0x141   :  { %735 = vrcp.f32 %v280_v50 }
 0x14b   :  { %v736_v51 = vpop.eup %735 }
 0x14c   :  { %v282_v52 = vmul.f32 %v736_v51, %v732_v48  ;;  %v283_v53 = vmul.f32 %v736_v51, %v734_v49 }
 0x14e   :  { %v284_v54 = vpack.c.bf16 %v282_v52, %v282_v52  ;;  %503 = vst [vmem:[#allocation9] sm:$0xff] %v282_v52  ;;  %v285_v55 = vpack.c.bf16 %v283_v53, %v283_v53  ;;  %504 = vst [vmem:[#allocation9 + $0x8] sm:$0xff] %v283_v53 }
 0x150   :  { %665 = vmatmul.mubr.bf16.vlgmr.msra.gmra.mrb[4].mxu0 %v284_v54  ;;  %685 = vmatmul.mubr.bf16.vlgmr.msra.gmra.mrb[4].mxu1 %v285_v55 }
 0x151   :  { %814 = shalt.err (!%p811_p0)
}
 0x152   :  { %s815_s8 = scalar_lea.hbm %s1026_s5, 256 }
 0x153   :  { %p816_p1 = scmp.ne.s32.totalorder %s1026_s5, %s815_s8  ;;  %p819_p2 = scmp.lt.u32.totalorder %s815_s8, %s1026_s5 }
 0x155   :  { %p821_p3 = pnand %p819_p2, %p816_p1 }
 0x157   :  { %824 = shalt.err (!%p821_p3)
}
 0x158   :  { %s863_s13 = smov 128   ;;  %s864_s14 = smov 8   ;;  %v555_v56 = vld [vmem:[%s1024_s3] ss:$0 sm:$0xff] }
 0x159   :  { %528 = dma.vmem_to_hbm [thread:$0]  %s523_s29, 256, %s1026_s5, [#allocation10], %s863_s13, %s863_s13, %s864_s14  }
 0x15a   :  { %s865_s18 = smov [#allocation8]  }
 0x15b   :  { %s510_s19 = sshll.u32 %s865_s18, 4  ;;  %s511_s19 = int_to_ptr.vmem [resolvable:$true] %s510_s19 }
 0x15c   :  { %s825_s5 = scalar_lea.vmem %s511_s19, 256  ;;  %p830_p5 = scmp.lt.s32.totalorder %s511_s19, %s511_s19 }
 0x15d   :  { %p826_p4 = scmp.ne.s32.totalorder %s511_s19, %s825_s5  ;;  %p831_p6 = scmp.lt.s32.totalorder %s825_s5, %s825_s5 }
 0x15f   :  { %p832_p7 = por %p831_p6, %p830_p5 }
 0x161   :  { %p833_p8 = pnand %p832_p7, %p826_p4 }
 0x223   :  { %v407_v57 = vpop.f32.mrb[4].mxu0  ;;  %v495_v58 = vpop.f32.mrb[4].mxu1 }
 0x224   :  { %v408_v59 = vadd.f32 %v555_v56, %v407_v57  ;;  %v496_v60 = vadd.f32 %v555_v56, %v495_v58  ;;  %v666_v61 = vpop.f32.mrb[5].mxu0  ;;  %v686_v62 = vpop.f32.mrb[5].mxu1 }
 0x225   :  { %v410_v63 = vpop.f32.mrb[6].mxu0  ;;  %v498_v0 = vpop.f32.mrb[6].mxu1 }
 0x226   :  { %501 = vst [vmem:[#allocation8] sm:$0xff] %v408_v59  ;;  %502 = vst [vmem:[#allocation8 + $0x8] sm:$0xff] %v496_v60  ;;  %v667_v1 = vpop.f32.mrb[7].mxu0  ;;  %v687_v2 = vpop.f32.mrb[7].mxu1 }
 0x227   :  { %836 = shalt.err (!%p833_p8)
}
 0x228   :  { %s837_s22 = scalar_lea.hbm %s1025_s4, 256 }
 0x229   :  { %p838_p9 = scmp.ne.s32.totalorder %s1025_s4, %s837_s22  ;;  %p841_p10 = scmp.lt.u32.totalorder %s837_s22, %s1025_s4 }
 0x22b   :  { %p843_p11 = pnand %p841_p10, %p838_p9 }
 0x22d   :  { %846 = shalt.err (!%p843_p11)
}
 0x22e   :  { %516 = dma.vmem_to_hbm [thread:$0]  %s511_s19, 256, %s1025_s4, [#allocation4], %s863_s13, %s863_s13, %s864_s14  }
 0x22f   :  { %851 = dma.done.wait [#allocation4], 256  }
 0x230   :  { %852 = vsyncadd [#allocation4], 4294967040 }
 0x231   :  { %853 = dma.done.wait [#allocation10], 256  }
 0x232   :  { %854 = vsyncadd [#allocation10], 4294967040 }
 0x233   :  { %535 = vsyncpa [#allocation3], 1 }
 0x234   :  { %536 = vsyncpa [#allocation6], 1 }
 0x235   :  { %537 = vsyncpa [#allocation4], 1 }
 0x236   :  { %538 = vsyncpa [#allocation10], 1 }

// kernel: tpu_custom_call.1
= control target key start
LH: loop header
LB: loop body
LE: loop exit
PB: predicated region body
PF: predicated region fallthrough
CT: control target
= control target key end

     0   :  { %11 = vsyncpa [#allocation3], 0  ;;  %s1021_s0 = inlined_call_operand.hbm [shape: bf16[2,128,128], index: 0, kind: input, shape index: {}]   ;;  %s1022_s1 = inlined_call_operand.hbm [shape: bf16[2,128,128], index: 1, kind: input, shape index: {}]   ;;  %s1023_s2 = inlined_call_operand.hbm [shape: bf16[2,8,128], index: 2, kind: input, shape index: {}]   ;;  %s1024_s3 = inlined_call_operand.vmem [shape: f32[1,1,128], index: 3, kind: input, shape index: {}]   ;;  %s1025_s4 = inlined_call_operand.hbm [shape: f32[2,8,128], index: 4, kind: output, shape index: {0}]   ;;  %s1026_s5 = inlined_call_operand.hbm [shape: f32[2,8,128], index: 5, kind: output, shape index: {1}]  }
   0x1   :  { %12 = vsyncpa [#allocation6], 0 }
   0x2   :  { %13 = vsyncpa [#allocation4], 0 }
   0x3   :  { %14 = vsyncpa [#allocation10], 0  ;;  %s855_s18 = smov [#allocation5]   ;;  %s856_s20 = smov [#allocation2]  }
   0x4   :  { %s32_s19 = sshll.u32 %s855_s18, 4  ;;  %s20_s21 = sshll.u32 %s856_s20, 4  ;;  %s33_s19 = int_to_ptr.vmem [resolvable:$true] %s32_s19  ;;  %s896_s21 = int_to_ptr.vmem [resolvable:$true] %s20_s21 }
   0x5   :  { %s737_s24 = scalar_lea.hbm %s1022_s1, 2048 }
   0x6   :  { %p738_p0 = scmp.ne.s32.totalorder %s1022_s1, %s737_s24  ;;  %p741_p1 = scmp.lt.u32.totalorder %s737_s24, %s1022_s1 }
   0x8   :  { %p743_p2 = pnand %p741_p1, %p738_p0 }
   0xa   :  { %746 = shalt.err (!%p743_p2)
}
   0xb   :  { %s747_s29 = scalar_lea.vmem %s33_s19, 2048  ;;  %p752_p4 = scmp.lt.s32.totalorder %s33_s19, %s33_s19 }
   0xc   :  { %p748_p3 = scmp.ne.s32.totalorder %s33_s19, %s747_s29  ;;  %p753_p5 = scmp.lt.s32.totalorder %s747_s29, %s747_s29 }
   0xe   :  { %p754_p6 = por %p753_p5, %p752_p4 }
  0x10   :  { %p755_p7 = pnand %p754_p6, %p748_p3 }
  0x12   :  { %758 = shalt.err (!%p755_p7)
}
  0x13   :  { %s857_s30 = smov 64   ;;  %s858_s6 = smov 4  }
  0x14   :  { %38 = dma.hbm_to_vmem [thread:$0]  %s1022_s1, 2048, %s33_s19, [#allocation6], %s857_s30, %s857_s30, %s858_s6  }
  0x15   :  { %s759_s11 = scalar_lea.hbm %s1021_s0, 2048 }
  0x16   :  { %p760_p8 = scmp.ne.s32.totalorder %s1021_s0, %s759_s11  ;;  %p763_p9 = scmp.lt.u32.totalorder %s759_s11, %s1021_s0 }
  0x18   :  { %p765_p10 = pnand %p763_p9, %p760_p8 }
  0x1a   :  { %768 = shalt.err (!%p765_p10)
}
  0x1b   :  { %s769_s16 = scalar_lea.vmem %s896_s21, 2048  ;;  %p774_p12 = scmp.lt.s32.totalorder %s896_s21, %s896_s21 }
  0x1c   :  { %p770_p11 = scmp.ne.s32.totalorder %s896_s21, %s769_s16  ;;  %p775_p13 = scmp.lt.s32.totalorder %s769_s16, %s769_s16 }
  0x1e   :  { %p776_p0 = por %p775_p13, %p774_p12 }
  0x20   :  { %p777_p1 = pnand %p776_p0, %p770_p11 }
  0x22   :  { %780 = shalt.err (!%p777_p1)
}
  0x23   :  { %26 = dma.hbm_to_vmem [thread:$0]  %s1021_s0, 2048, %s896_s21, [#allocation3], %s857_s30, %s857_s30, %s858_s6  }
  0x24   :  { %s859_s18 = smov [#allocation7]   ;;  %s781_s23 = scalar_lea.hbm %s1023_s2, 128 }
  0x25   :  { %s44_s19 = sshll.u32 %s859_s18, 4  ;;  %p782_p2 = scmp.ne.s32.totalorder %s1023_s2, %s781_s23  ;;  %s45_s19 = int_to_ptr.vmem [resolvable:$true] %s44_s19 }
  0x26   :  { %p785_p3 = scmp.lt.u32.totalorder %s781_s23, %s1023_s2 }
  0x28   :  { %p787_p4 = pnand %p785_p3, %p782_p2 }
  0x2a   :  { %790 = shalt.err (!%p787_p4)
}
  0x2b   :  { %s791_s28 = scalar_lea.vmem %s45_s19, 128  ;;  %p796_p6 = scmp.lt.s32.totalorder %s45_s19, %s45_s19 }
  0x2c   :  { %p792_p5 = scmp.ne.s32.totalorder %s45_s19, %s791_s28  ;;  %p797_p7 = scmp.lt.s32.totalorder %s791_s28, %s791_s28 }
  0x2e   :  { %p798_p8 = por %p797_p7, %p796_p6 }
  0x30   :  { %p799_p9 = pnand %p798_p8, %p792_p5 }
  0x32   :  { %802 = shalt.err (!%p799_p9)
}
  0x33   :  { %50 = dma.hbm_to_vmem [thread:$0]  %s1023_s2, 128, %s45_s19, [#allocation6], %s857_s30, %s857_s30, %s858_s6  }
  0x34   :  { %847 = dma.done.wait [#allocation3], 2048  }
  0x35   :  { %848 = vsyncadd [#allocation3], 4294965248 }
  0x36   :  { %849 = dma.done.wait [#allocation6], 2176  }
  0x37   :  { %850 = vsyncadd [#allocation6], 4294965120  ;;  %v860_v0 = vmov 0.0   ;;  %vm861_vm0 = vmmov 0   ;;  %v699_v1 = vld [vmem:[#allocation2] sm:$0xff]   ;;  %v701_v3 = vld [vmem:[#allocation2 + $0x8] sm:$0xff]  }
  0x38   :  { %608 = vmatprep.subr.bf16.mxu0 %v860_v0  ;;  %628 = vmatprep.subr.bf16.mxu1 %v860_v0  ;;  %v700_v2 = vld [vmem:[#allocation2 + $0x40] sm:$0xff]   ;;  %v702_v4 = vld [vmem:[#allocation2 + $0x48] sm:$0xff]   ;;  %v703_v5 = vld [vmem:[#allocation2 + $0x10] sm:$0xff]   ;;  %s862_s2 = smov [#allocation9]  }
  0x39   :  { %624 = vmatprep.mubr.msk.bf16.mxu0 %vm861_vm0, %v860_v0  ;;  %644 = vmatprep.mubr.msk.bf16.mxu1 %vm861_vm0, %v860_v0  ;;  %v704_v6 = vld [vmem:[#allocation2 + $0x50] sm:$0xff]   ;;  %v705_v7 = vld [vmem:[#allocation2 + $0x18] sm:$0xff]   ;;  %v707_v9 = vld [vmem:[#allocation2 + $0x20] sm:$0xff]   ;;  %s522_s29 = sshll.u32 %s862_s2, 4  ;;  %s523_s29 = int_to_ptr.vmem [resolvable:$true] %s522_s29 }
  0x3a   :  { %609 = vmatpush3.bf16.msra.mxu0 %v699_v1  ;;  %629 = vmatpush3.bf16.msra.mxu1 %v700_v2  ;;  %v706_v8 = vld [vmem:[#allocation2 + $0x58] sm:$0xff]   ;;  %v708_v10 = vld [vmem:[#allocation2 + $0x60] sm:$0xff]   ;;  %v709_v11 = vld [vmem:[#allocation2 + $0x28] sm:$0xff]   ;;  %s803_s30 = scalar_lea.vmem %s523_s29, 256  ;;  %p808_p11 = scmp.lt.s32.totalorder %s523_s29, %s523_s29 }
  0x3b   :  { %610 = vmatprep.subr.bf16.mxu0 %v860_v0  ;;  %630 = vmatprep.subr.bf16.mxu1 %v860_v0  ;;  %v710_v12 = vld [vmem:[#allocation2 + $0x68] sm:$0xff]   ;;  %v711_v13 = vld [vmem:[#allocation2 + $0x30] sm:$0xff]   ;;  %v713_v15 = vld [vmem:[#allocation2 + $0x38] sm:$0xff]   ;;  %p804_p10 = scmp.ne.s32.totalorder %s523_s29, %s803_s30  ;;  %p809_p12 = scmp.lt.s32.totalorder %s803_s30, %s803_s30 }
  0x3c   :  { %v712_v14 = vld [vmem:[#allocation2 + $0x70] sm:$0xff]   ;;  %v714_v16 = vld [vmem:[#allocation2 + $0x78] sm:$0xff]   ;;  %v63_v17 = vld [vmem:[#allocation7] sm:$0xf] }
  0x3d   :  { %v64_v18 = vld [vmem:[#allocation7 + $0x4] sm:$0xf]  ;;  %v717_v21 = vld [vmem:[#allocation5 + $0x8] sm:$0xff]   ;;  %v719_v23 = vld [vmem:[#allocation5 + $0x10] sm:$0xff]   ;;  %p810_p13 = por %p809_p12, %p808_p11 }
  0x3e   :  { %611 = vmatpush3.bf16.msra.mxu0 %v701_v3  ;;  %631 = vmatpush3.bf16.msra.mxu1 %v702_v4  ;;  %v715_v19 = vld [vmem:[#allocation5] sm:$0xff]   ;;  %v718_v22 = vld [vmem:[#allocation5 + $0x48] sm:$0xff]   ;;  %v720_v24 = vld [vmem:[#allocation5 + $0x50] sm:$0xff]  }
  0x3f   :  { %612 = vmatprep.subr.bf16.mxu0 %v860_v0  ;;  %632 = vmatprep.subr.bf16.mxu1 %v860_v0  ;;  %v716_v20 = vld [vmem:[#allocation5 + $0x40] sm:$0xff]   ;;  %v721_v25 = vld [vmem:[#allocation5 + $0x18] sm:$0xff]   ;;  %v725_v29 = vld [vmem:[#allocation5 + $0x28] sm:$0xff]   ;;  %p811_p0 = pnand %p810_p13, %p804_p10 }
  0x40   :  { %v722_v26 = vld [vmem:[#allocation5 + $0x58] sm:$0xff]   ;;  %v723_v27 = vld [vmem:[#allocation5 + $0x20] sm:$0xff]   ;;  %v726_v30 = vld [vmem:[#allocation5 + $0x68] sm:$0xff]  }
  0x41   :  { %v724_v28 = vld [vmem:[#allocation5 + $0x60] sm:$0xff]   ;;  %v727_v31 = vld [vmem:[#allocation5 + $0x30] sm:$0xff]   ;;  %v729_v33 = vld [vmem:[#allocation5 + $0x38] sm:$0xff]  }
  0x42   :  { %613 = vmatpush3.bf16.msra.mxu0 %v703_v5  ;;  %633 = vmatpush3.bf16.msra.mxu1 %v704_v6  ;;  %v728_v32 = vld [vmem:[#allocation5 + $0x70] sm:$0xff]   ;;  %v730_v34 = vld [vmem:[#allocation5 + $0x78] sm:$0xff]  }
  0x43   :  { %614 = vmatprep.subr.bf16.mxu0 %v860_v0  ;;  %634 = vmatprep.subr.bf16.mxu1 %v860_v0 }
  0x46   :  { %615 = vmatpush3.bf16.msra.mxu0 %v705_v7  ;;  %635 = vmatpush3.bf16.msra.mxu1 %v706_v8 }
  0x47   :  { %616 = vmatprep.subr.bf16.mxu0 %v860_v0  ;;  %636 = vmatprep.subr.bf16.mxu1 %v860_v0 }
  0x4a   :  { %617 = vmatpush3.bf16.msra.mxu0 %v707_v9  ;;  %637 = vmatpush3.bf16.msra.mxu1 %v708_v10 }
  0x4b   :  { %618 = vmatprep.subr.bf16.mxu0 %v860_v0  ;;  %638 = vmatprep.subr.bf16.mxu1 %v860_v0 }
  0x4e   :  { %619 = vmatpush3.bf16.msra.mxu0 %v709_v11  ;;  %639 = vmatpush3.bf16.msra.mxu1 %v710_v12 }
  0x4f   :  { %620 = vmatprep.subr.bf16.mxu0 %v860_v0  ;;  %640 = vmatprep.subr.bf16.mxu1 %v860_v0 }
  0x52   :  { %621 = vmatpush3.bf16.msra.mxu0 %v711_v13  ;;  %641 = vmatpush3.bf16.msra.mxu1 %v712_v14 }
  0x53   :  { %622 = vmatprep.subr.bf16.mxu0 %v860_v0  ;;  %642 = vmatprep.subr.bf16.mxu1 %v860_v0 }
  0x56   :  { %623 = vmatpush3.bf16.msra.mxu0 %v713_v15  ;;  %643 = vmatpush3.bf16.msra.mxu1 %v714_v16 }
  0x57   :  { %648 = vmatprep.subr.bf16.mxu0 %v860_v0  ;;  %668 = vmatprep.subr.bf16.mxu1 %v860_v0 }
  0x59   :  { %625 = vmatmul.mubr.bf16.vlgmr.msra.gmra.mrb[0].mxu0 %v63_v17  ;;  %645 = vmatmul.mubr.bf16.vlgmr.msra.gmra.mrb[0].mxu1 %v64_v18 }
  0x5a   :  { %664 = vmatprep.mubr.msk.bf16.mxu0 %vm861_vm0, %v860_v0  ;;  %684 = vmatprep.mubr.msk.bf16.mxu1 %vm861_vm0, %v860_v0 }
  0x5b   :  { %649 = vmatpush3.bf16.msra.mxu0 %v715_v19  ;;  %669 = vmatpush3.bf16.msra.mxu1 %v716_v20 }
  0x5c   :  { %650 = vmatprep.subr.bf16.mxu0 %v860_v0  ;;  %670 = vmatprep.subr.bf16.mxu1 %v860_v0 }
  0x5f   :  { %651 = vmatpush3.bf16.msra.mxu0 %v717_v21  ;;  %671 = vmatpush3.bf16.msra.mxu1 %v718_v22 }
  0x60   :  { %652 = vmatprep.subr.bf16.mxu0 %v860_v0  ;;  %672 = vmatprep.subr.bf16.mxu1 %v860_v0 }
  0x63   :  { %653 = vmatpush3.bf16.msra.mxu0 %v719_v23  ;;  %673 = vmatpush3.bf16.msra.mxu1 %v720_v24 }
  0x64   :  { %654 = vmatprep.subr.bf16.mxu0 %v860_v0  ;;  %674 = vmatprep.subr.bf16.mxu1 %v860_v0 }
  0x67   :  { %655 = vmatpush3.bf16.msra.mxu0 %v721_v25  ;;  %675 = vmatpush3.bf16.msra.mxu1 %v722_v26 }
  0x68   :  { %656 = vmatprep.subr.bf16.mxu0 %v860_v0  ;;  %676 = vmatprep.subr.bf16.mxu1 %v860_v0 }
  0x6b   :  { %657 = vmatpush3.bf16.msra.mxu0 %v723_v27  ;;  %677 = vmatpush3.bf16.msra.mxu1 %v724_v28 }
  0x6c   :  { %658 = vmatprep.subr.bf16.mxu0 %v860_v0  ;;  %678 = vmatprep.subr.bf16.mxu1 %v860_v0 }
  0x6f   :  { %659 = vmatpush3.bf16.msra.mxu0 %v725_v29  ;;  %679 = vmatpush3.bf16.msra.mxu1 %v726_v30 }
  0x70   :  { %660 = vmatprep.subr.bf16.mxu0 %v860_v0  ;;  %680 = vmatprep.subr.bf16.mxu1 %v860_v0 }
  0x73   :  { %661 = vmatpush3.bf16.msra.mxu0 %v727_v31  ;;  %681 = vmatpush3.bf16.msra.mxu1 %v728_v32 }
  0x74   :  { %662 = vmatprep.subr.bf16.mxu0 %v860_v0  ;;  %682 = vmatprep.subr.bf16.mxu1 %v860_v0 }
  0x77   :  { %663 = vmatpush3.bf16.msra.mxu0 %v729_v33  ;;  %683 = vmatpush3.bf16.msra.mxu1 %v730_v34 }
 0x12c   :  { %v179_v35 = vpop.f32.mrb[0].mxu0  ;;  %v267_v36 = vpop.f32.mrb[0].mxu1 }
 0x12d   :  { %v626_v37 = vpop.f32.mrb[1].mxu0  ;;  %v273_v38 = vmax.f32 %v179_v35, %v267_v36  ;;  %v646_v39 = vpop.f32.mrb[1].mxu1 }
 0x12e   :  { %v182_v40 = vpop.f32.mrb[2].mxu0  ;;  %v270_v41 = vpop.f32.mrb[2].mxu1 }
 0x12f   :  { %v627_v42 = vpop.f32.mrb[3].mxu0  ;;  %v274_v43 = vsub.f32 %v179_v35, %v273_v38  ;;  %v275_v44 = vsub.f32 %v267_v36, %v273_v38  ;;  %v647_v45 = vpop.f32.mrb[3].mxu1 }
 0x131   :  { %v276_v46 = vmul.f32 1.442695, %v274_v43  ;;  %v278_v47 = vmul.f32 1.442695, %v275_v44 }
 0x133   :  { %731 = vpow2.f32 %v276_v46 }
 0x134   :  { %733 = vpow2.f32 %v278_v47 }
 0x13d   :  { %v732_v48 = vpop.eup %731 }
 0x13e   :  { %v734_v49 = vpop.eup %733 }
 0x13f   :  { %v280_v50 = vadd.f32 %v734_v49, %v732_v48 }
 0x141   :  { %735 = vrcp.f32 %v280_v50 }
 0x14b   :  { %v736_v51 = vpop.eup %735 }
 0x14c   :  { %v282_v52 = vmul.f32 %v736_v51, %v732_v48  ;;  %v283_v53 = vmul.f32 %v736_v51, %v734_v49 }
 0x14e   :  { %v284_v54 = vpack.c.bf16 %v282_v52, %v282_v52  ;;  %503 = vst [vmem:[#allocation9] sm:$0xff] %v282_v52  ;;  %v285_v55 = vpack.c.bf16 %v283_v53, %v283_v53  ;;  %504 = vst [vmem:[#allocation9 + $0x8] sm:$0xff] %v283_v53 }
 0x150   :  { %665 = vmatmul.mubr.bf16.vlgmr.msra.gmra.mrb[4].mxu0 %v284_v54  ;;  %685 = vmatmul.mubr.bf16.vlgmr.msra.gmra.mrb[4].mxu1 %v285_v55 }
 0x151   :  { %814 = shalt.err (!%p811_p0)
}
 0x152   :  { %s815_s8 = scalar_lea.hbm %s1026_s5, 256 }
 0x153   :  { %p816_p1 = scmp.ne.s32.totalorder %s1026_s5, %s815_s8  ;;  %p819_p2 = scmp.lt.u32.totalorder %s815_s8, %s1026_s5 }
 0x155   :  { %p821_p3 = pnand %p819_p2, %p816_p1 }
 0x157   :  { %824 = shalt.err (!%p821_p3)
}
 0x158   :  { %s863_s13 = smov 128   ;;  %s864_s14 = smov 8   ;;  %v555_v56 = vld [vmem:[%s1024_s3] ss:$0 sm:$0xff] }
 0x159   :  { %528 = dma.vmem_to_hbm [thread:$0]  %s523_s29, 256, %s1026_s5, [#allocation10], %s863_s13, %s863_s13, %s864_s14  }
 0x15a   :  { %s865_s18 = smov [#allocation8]  }
 0x15b   :  { %s510_s19 = sshll.u32 %s865_s18, 4  ;;  %s511_s19 = int_to_ptr.vmem [resolvable:$true] %s510_s19 }
 0x15c   :  { %s825_s5 = scalar_lea.vmem %s511_s19, 256  ;;  %p830_p5 = scmp.lt.s32.totalorder %s511_s19, %s511_s19 }
 0x15d   :  { %p826_p4 = scmp.ne.s32.totalorder %s511_s19, %s825_s5  ;;  %p831_p6 = scmp.lt.s32.totalorder %s825_s5, %s825_s5 }
 0x15f   :  { %p832_p7 = por %p831_p6, %p830_p5 }
 0x161   :  { %p833_p8 = pnand %p832_p7, %p826_p4 }
 0x223   :  { %v407_v57 = vpop.f32.mrb[4].mxu0  ;;  %v495_v58 = vpop.f32.mrb[4].mxu1 }
 0x224   :  { %v408_v59 = vadd.f32 %v555_v56, %v407_v57  ;;  %v496_v60 = vadd.f32 %v555_v56, %v495_v58  ;;  %v666_v61 = vpop.f32.mrb[5].mxu0  ;;  %v686_v62 = vpop.f32.mrb[5].mxu1 }
 0x225   :  { %v410_v63 = vpop.f32.mrb[6].mxu0  ;;  %v498_v0 = vpop.f32.mrb[6].mxu1 }
 0x226   :  { %501 = vst [vmem:[#allocation8] sm:$0xff] %v408_v59  ;;  %502 = vst [vmem:[#allocation8 + $0x8] sm:$0xff] %v496_v60  ;;  %v667_v1 = vpop.f32.mrb[7].mxu0  ;;  %v687_v2 = vpop.f32.mrb[7].mxu1 }
 0x227   :  { %836 = shalt.err (!%p833_p8)
}
 0x228   :  { %s837_s22 = scalar_lea.hbm %s1025_s4, 256 }
 0x229   :  { %p838_p9 = scmp.ne.s32.totalorder %s1025_s4, %s837_s22  ;;  %p841_p10 = scmp.lt.u32.totalorder %s837_s22, %s1025_s4 }
 0x22b   :  { %p843_p11 = pnand %p841_p10, %p838_p9 }
 0x22d   :  { %846 = shalt.err (!%p843_p11)
}
 0x22e   :  { %516 = dma.vmem_to_hbm [thread:$0]  %s511_s19, 256, %s1025_s4, [#allocation4], %s863_s13, %s863_s13, %s864_s14  }
 0x22f   :  { %851 = dma.done.wait [#allocation4], 256  }
 0x230   :  { %852 = vsyncadd [#allocation4], 4294967040 }
 0x231   :  { %853 = dma.done.wait [#allocation10], 256  }
 0x232   :  { %854 = vsyncadd [#allocation10], 4294967040 }
 0x233   :  { %535 = vsyncpa [#allocation3], 1 }
 0x234   :  { %536 = vsyncpa [#allocation6], 1 }
 0x235   :  { %537 = vsyncpa [#allocation4], 1 }
 0x236   :  { %538 = vsyncpa [#allocation10], 1 }

</bundles_post_ra>
